<compile_context>
chip_gen: v5e
topology: v5e:2x2
jax: 0.10.0
libtpu: 0.0.40
codegen_flags: <defaults>
</compile_context>

<pallas_src>
import numpy as np
import jax
import jax.numpy as jnp
from jax import lax
from jax.experimental import pallas as pl
from jax.experimental.pallas import tpu as pltpu


def _cdiv(a, b):
    return -(-a // b)


def _build_pool_matrix(L, kernel_size, stride):
    """Pooling matrix folding replicate-padding + avg-pool into (L_out, L)."""
    pad = (kernel_size - 1) // 2
    L_pad = L + 2 * pad
    L_out = (L_pad - kernel_size) // stride + 1
    W = np.zeros((L_out, L), dtype=np.float32)
    inv_k = 1.0 / float(kernel_size)
    for t in range(L_out):
        for k in range(kernel_size):
            j_padded = t * stride + k               # index into padded sequence
            j = min(max(j_padded - pad, 0), L - 1)  # replicate-pad clamp
            W[t, j] += inv_k
    return W, L_out


def _vmem_budget_and_limit():
    """Generation-aware (tile budget, vmem_limit_bytes)."""
    cap = 128 * 1024 * 1024
    try:
        info = pltpu.get_tpu_info()
        cap = int(getattr(info, "vmem_capacity_bytes", cap))
    except Exception:
        pass
    if cap <= 64 * 1024 * 1024:                      # v7x: 64 MiB per TensorCore
        return 24 * 1024 * 1024, 32 * 1024 * 1024
    return 48 * 1024 * 1024, 64 * 1024 * 1024        # v5e / v6e: 128 MiB physical


def _choose_tiles(B, L, L_out, C, itemsize, budget):
    """(TB, TC) batch/channel tiles sized to the VMEM budget."""
    w_bytes = 2 * L_out * L * itemsize               # W block (double-buffered)
    avail = max(budget - w_bytes, 128 * 1024)
    per_bc = 2 * (L + L_out) * itemsize              # x + out column, double-buffered

    # Channel tile: keep the whole channel axis when it fits (native layout,
    # no padding); otherwise fall back to a 128-multiple lane tile.
    max_lanes = max(avail // per_bc, 128)
    tc = C if C <= max_lanes else max(128, (max_lanes // 128) * 128)

    # Batch tile: fill the remaining budget (amortizes per-grid-step overhead).
    tb = int(max(1, min(B, avail // (per_bc * tc))))

    # Keep >= 2 grid steps when possible so both v7x TensorCores get work.
    if B > 1 and tb >= B and _cdiv(C, tc) == 1:
        tb = max(1, B // 2)
    elif B == 1 and _cdiv(C, tc) == 1 and C % 256 == 0:
        tc = C // 2
    return tb, tc


def _make_kernel(tb):
    def kernel(w_ref, x_ref, o_ref):
        # w_ref: (L_out, L) constant pooling matrix (resident across the grid)
        # x_ref: (TB, L, TC)   native-layout block of x
        # o_ref: (TB, L_out, TC)
        w = w_ref[...]

        def step(b):
            o_ref[b] = jnp.dot(
                w, x_ref[b], preferred_element_type=jnp.float32
            ).astype(o_ref.dtype)

        if tb <= 8:
            for b in range(tb):          # short fixed trip count: unroll at trace time
                step(b)
        else:
            def body(b, carry):
                step(b)
                return carry
            lax.fori_loop(0, tb, body, 0)
    return kernel


def moving_avg(x, kernel_size, stride):
    """x: (B, L, C) float array. Returns (B, L_out, C) = replicate-pad + AvgPool1d."""
    B, L, C = x.shape
    W_np, L_out = _build_pool_matrix(L, kernel_size, stride)
    w_dtype = (x.dtype if x.dtype in (jnp.dtype(jnp.bfloat16), jnp.dtype(jnp.float32))
               else jnp.float32)
    W = jnp.asarray(W_np, dtype=w_dtype)

    itemsize = jnp.dtype(x.dtype).itemsize
    budget, vmem_limit = _vmem_budget_and_limit()
    TB, TC = _choose_tiles(B, L, L_out, C, itemsize, budget)
    grid = (_cdiv(B, TB), _cdiv(C, TC))

    cost = pl.CostEstimate(
        flops=2 * B * L_out * L * C,
        transcendentals=0,
        bytes_accessed=itemsize * (B * L * C + B * L_out * C)
        + jnp.dtype(w_dtype).itemsize * L_out * L,
    )

    return pl.pallas_call(
        _make_kernel(TB),
        out_shape=jax.ShapeDtypeStruct((B, L_out, C), x.dtype),
        grid_spec=pltpu.PrefetchScalarGridSpec(
            num_scalar_prefetch=0,
            grid=grid,
            in_specs=[
                # Constant index_map -> DMA'd once, resident across the grid.
                pl.BlockSpec((L_out, L), lambda i, j: (0, 0)),
                # Native (B, L, C) layout: batch tiles x channel tiles, full time axis.
                pl.BlockSpec((TB, L, TC), lambda i, j: (i, 0, j)),
            ],
            out_specs=pl.BlockSpec((TB, L_out, TC), lambda i, j: (i, 0, j)),
        ),
        compiler_params=pltpu.CompilerParams(
            dimension_semantics=("parallel", "parallel"),
            vmem_limit_bytes=vmem_limit,
        ),
        cost_estimate=cost,
    )(W, x)


def _moving_avg_ref(x, kernel_size, stride):
    """Pure-JAX reference mirroring the PyTorch module."""
    pad = (kernel_size - 1) // 2
    front = jnp.repeat(x[:, 0:1, :], pad, axis=1)
    end = jnp.repeat(x[:, -1:, :], pad, axis=1)
    xp = jnp.concatenate([front, x, end], axis=1)            # (B, L_pad, C)
    L_pad = xp.shape[1]
    L_out = (L_pad - kernel_size) // stride + 1
    outs = []
    for t in range(L_out):
        outs.append(jnp.mean(xp[:, t * stride:t * stride + kernel_size, :],
                             axis=1, keepdims=True))
    return jnp.concatenate(outs, axis=1)


if __name__ == "__main__":
    key = jax.random.PRNGKey(0)

    # Primary test: stride-1 moving average as used by TrafficStream.
    B, L, C = 2, 8, 32
    kernel_size, stride = 3, 1
    x = jax.random.normal(key, (B, L, C), dtype=jnp.float32)
    out = jax.block_until_ready(moving_avg(x, kernel_size, stride))
    ref = _moving_avg_ref(x, kernel_size, stride)
    np.testing.assert_allclose(np.asarray(out), np.asarray(ref),
                               rtol=1e-5, atol=1e-5)

    # Secondary test: strided pooling, C not a multiple of 128, odd batch.
    B2, L2, C2 = 3, 12, 40
    k2, s2 = 5, 2
    x2 = jax.random.normal(jax.random.PRNGKey(1), (B2, L2, C2), dtype=jnp.float32)
    out2 = jax.block_until_ready(moving_avg(x2, k2, s2))
    ref2 = _moving_avg_ref(x2, k2, s2)
    np.testing.assert_allclose(np.asarray(out2), np.asarray(ref2),
                               rtol=1e-5, atol=1e-5)

    print("KERNEL_OK")
</pallas_src>

<mosaic_0001>
module attributes {stable_mosaic.version = 11 : i64} {
  func.func @kernel(%arg0: i32, %arg1: i32, %arg2: memref<8x8xf32, #tpu.memory_space<vmem>>, %arg3: memref<1x8x32xf32, #tpu.memory_space<vmem>>, %arg4: memref<1x8x32xf32, #tpu.memory_space<vmem>>) attributes {dimension_semantics = [#tpu.dimension_semantics<parallel>, #tpu.dimension_semantics<parallel>], iteration_bounds = array<i64: 2, 1>, scalar_prefetch = 0 : i64, scratch_operands = 0 : i64, tpu.core_type = #tpu.core_type<tc>, window_params = [{pipeline_mode = #tpu.pipeline_mode<synchronous>, transform_indices = @transform_0, window_bounds = array<i64: 8, 8>}, {transform_indices = @transform_1, window_bounds = array<i64: 1, 8, 32>}, {transform_indices = @transform_2, window_bounds = array<i64: 1, 8, 32>}]} {
    %c0 = arith.constant 0 : index
    %c0_0 = arith.constant 0 : index
    %0 = vector.load %arg2[%c0, %c0_0] : memref<8x8xf32, #tpu.memory_space<vmem>>, vector<8x8xf32>
    %c0_1 = arith.constant 0 : index
    %c0_2 = arith.constant 0 : index
    %c0_3 = arith.constant 0 : index
    %1 = vector.load %arg3[%c0_1, %c0_2, %c0_3] : memref<1x8x32xf32, #tpu.memory_space<vmem>>, vector<1x8x32xf32>
    %2 = vector.shape_cast %1 : vector<1x8x32xf32> to vector<8x32xf32>
    %cst = arith.constant dense<0.000000e+00> : vector<8x32xf32>
    %3 = tpu.matmul %0, %2, %cst {dimension_numbers = #tpu.dot_dimension_numbers<[1], [0], [0], [1], [0, 0, 1, 1], [], []>} : vector<8x8xf32>, vector<8x32xf32>, vector<8x32xf32> -> vector<8x32xf32>
    %c0_4 = arith.constant 0 : index
    %c0_5 = arith.constant 0 : index
    %c0_6 = arith.constant 0 : index
    %4 = vector.load %arg4[%c0_4, %c0_5, %c0_6] : memref<1x8x32xf32, #tpu.memory_space<vmem>>, vector<1x8x32xf32>
    %5 = vector.shape_cast %4 : vector<1x8x32xf32> to vector<8x32xf32>
    %6 = vector.shape_cast %3 : vector<8x32xf32> to vector<1x8x32xf32>
    tpu.vector_store %arg4[%c0_4, %c0_5, %c0_6], %6 {strides = array<i32>} : memref<1x8x32xf32, #tpu.memory_space<vmem>>, vector<1x8x32xf32>,
    return
  }
  func.func @transform_0(%arg0: i32, %arg1: i32) -> (i32, i32) {
    %c0_i32 = arith.constant 0 : i32
    %c0_i32_0 = arith.constant 0 : i32
    %c0_i32_1 = arith.constant 0 : i32
    return %c0_i32, %c0_i32_0 : i32, i32
  }
  func.func @transform_1(%arg0: i32, %arg1: i32) -> (i32, i32, i32) {
    %c0_i32 = arith.constant 0 : i32
    %c0_i32_0 = arith.constant 0 : i32
    return %arg0, %c0_i32, %arg1 : i32, i32, i32
  }
  func.func @transform_2(%arg0: i32, %arg1: i32) -> (i32, i32, i32) {
    %c0_i32 = arith.constant 0 : i32
    %c0_i32_0 = arith.constant 0 : i32
    return %arg0, %c0_i32, %arg1 : i32, i32, i32
  }
}

</mosaic_0001>

<bundles_post_ra>
// kernel: tpu_custom_call.1
= control target key start
LH: loop header
LB: loop body
LE: loop exit
PB: predicated region body
PF: predicated region fallthrough
CT: control target
= control target key end

     0   :  { %7 = vsyncpa [#allocation3], 0  ;;  %s732_s0 = inlined_call_operand.hbm [shape: f32[8,8], index: 0, kind: input, shape index: {}]   ;;  %s733_s1 = inlined_call_operand.hbm [shape: f32[2,8,32], index: 1, kind: input, shape index: {}]   ;;  %s734_s2 = inlined_call_operand.hbm [shape: f32[2,8,32], index: 2, kind: output, shape index: {}]  }
   0x1   :  { %8 = vsyncpa [#allocation6], 0 }
   0x2   :  { %10 = vsyncpa [#allocation6 + $0x1], 0 }
   0x3   :  { %11 = vsyncpa [#allocation4], 0 }
   0x4   :  { %13 = vsyncpa [#allocation4 + $0x1], 0  ;;  %s583_s9 = smov 0   ;;  %s585_s10 = smov 0  }
   0x5   :  { %s587_s11 = smov 0   ;;  %s589_s12 = smov 0  }
   0x6   :  { %s591_s13 = smov 0   ;;  %s593_s14 = smov 0  }
   0x7 LB: > { %s330_s15 = sadd.s32 4294967295, %s565_s14   ;;  %s331_s16 = sadd.s32 4294967294, %s565_s14   ;;  %s565_s14 = sphi %s593_s14, %s19_s14   ;;  %s561_s13 = sphi %s591_s13, %s746_s13   ;;  %s557_s12 = sphi %s589_s12, %s745_s12   ;;  %s553_s11 = sphi %s587_s11, %s744_s11   ;;  %s549_s10 = sphi %s585_s10, %s743_s10   ;;  %s545_s9 = sphi %s583_s9, %s742_s9  }
   0x8   : > { %p74_p0 = scmp.ne.s32.totalorder %s549_s10, %s545_s9  ;;  %p617_p1 = scmp.eq.s32.totalorder %s330_s15, 0 }
   0x9   : > { %p621_p2 = scmp.eq.s32.totalorder %s330_s15, 1  ;;  %p106_p3 = scmp.eq.s32.totalorder %s331_s16, 1 }
   0xa   : > { %p627_p4 = por %p617_p1, %p74_p0  ;;  %p332_p5 = scmp.ge.s32.totalorder %s565_s14, 1 }
   0xb   : > { %p632_p6 = por %p106_p3, %p74_p0  ;;  %p113_p7 = scmp.lt.s32.totalorder %s565_s14, 3 }
   0xc   : > { %s125_s23 = sshll.u32 %s732_s0, 4  ;;  %p334_p9 = scmp.ge.s32.totalorder %s565_s14, 2  ;;  %s126_s23 = int_to_ptr.hbm [resolvable:$true] %s125_s23 }
   0xd   : > { %p640_p8 = pnand %p332_p5, %p113_p7  ;;  %s567_s25 = smov [#allocation2]  }
   0xe   : > { %s127_s26 = sshll.u32 %s567_s25, 4  ;;  %s31_s27 = sadd.s32 1, %s561_s13  ;;  %s128_s26 = int_to_ptr.vmem [resolvable:$true] %s127_s26 }
   0xf   : > { %p354_p10 = pneg %p640_p8  ;;  %p33_p12 = scmp.ge.s32.totalorder %s31_s27, 2 }
  0x10   : > { %s61_s28 = sadd.s32 1, %s553_s11  ;;  %p68_p13 = scmp.ne.s32.totalorder %s553_s11, %s549_s10 }
  0x11   : > { %p355_p11 = pnand %p354_p10, %p617_p1  ;;  %p69_p0 = scmp.eq.s32.totalorder %s565_s14, 0 }
  0x12   : > { %s748_s27 = smov (%p33_p12, %s31_s27), 0  ;;  %p662_p5 = por %p621_p2, %p68_p13 }
  0x13   : > { %357 = dma.hbm_to_vmem [thread:$0]  (!%p355_p11), %s126_s23, 128, %s128_s26, [#allocation3]  }
  0x14   : > { %p656_p3 = por %p69_p0, %p68_p13  ;;  %s56_s3 = ssub.s32 %s561_s13, %s748_s27 }
  0x15   : > { %p367_p7 = scmp.lt.s32.totalorder %s565_s14, 2  ;;  %p59_p10 = scmp.eq.s32.totalorder %s56_s3, 0 }
  0x16   : > { %s138_s4 = sand.u32 1, %s553_s11   ;;  %s336_s7 = sshll.u32 %s561_s13, 3 }
  0x17   : > { %s335_s5 = sshll.u32 %s138_s4, 3  ;;  %s147_s16 = scalar_lea.hbm %s733_s1, %s336_s7 }
  0x18   : > { %s671_s6 = scalar_select %p59_p10, %s553_s11, %s61_s28  }
  0x19   : > { %s142_s21 = scalar_lea.vmem [#allocation5], %s335_s5  ;;  %s149_s18 = sshll.u32 %s147_s16, 4  ;;  %s150_s18 = int_to_ptr.hbm [resolvable:$true] %s149_s18 }
  0x1a   : > { %s151_s22 = sshll.u32 %s142_s21, 4  ;;  %p359_p2 = pnand %p367_p7, %p656_p3  ;;  %s152_s22 = int_to_ptr.vmem [resolvable:$true] %s151_s22 }
  0x1b   : > { %s139_s23 = scalar_lea.sflag [#allocation6], %s138_s4  ;;  %160 = sbr.rel (%p640_p8) target bundleno = 168 (0xa8), region = 28 }
  0x1c   : > { %361 = dma.hbm_to_vmem [thread:$0]  (!%p359_p2), %s150_s18, 128, %s152_s22, %s139_s23  }
  0x20   : > { %532 = dma.done.wait (%p617_p1), [#allocation3], 128  }
  0x21   : > { %534 = vsyncadd (%p617_p1), [#allocation3], 4294967168  ;;  %s686_s25 = sand.u32 1, %s549_s10  }
  0x22   : > { %s339_s26 = sshll.u32 %s686_s25, 3  ;;  %s168_s28 = scalar_lea.sflag [#allocation6], %s686_s25 }
  0x23   : > { %s171_s29 = scalar_lea.vmem [#allocation5], %s339_s26 }
  0x24   : > { %536 = dma.done.wait (%p627_p4), %s168_s28, 128  }
  0x25   : > { %538 = vsyncadd (%p627_p4), %s168_s28, 4294967168  ;;  %vm195_vm0 = vcmask 64512   ;;  %v194_v0 = vld [vmem:[%s171_s29] sm:$0xff]  ;;  %v193_v1 = vld [vmem:[#allocation2] sm:$0xff]  ;;  %s343_s17 = sshll.u32 %s557_s12, 3  ;;  %s192_s5 = scalar_lea.vmem [#allocation7], %s339_s26 }
  0x26   : > { %214 = vmatpush.msra.mxu0 %v194_v0  ;;  %s233_s4 = scalar_lea.hbm %s734_s2, %s343_s17  ;;  %s235_s7 = sshll.u32 %s192_s5, 4  ;;  %vm219_vm1 = vcmask 261120   ;;  %s236_s7 = int_to_ptr.vmem [resolvable:$true] %s235_s7 }
  0x27   : > { %341 = vmatmul.msk.f32.vlgmr.msra.gmra.mxu0 %vm195_vm0, %v193_v1  ;;  %s237_s8 = sshll.u32 %s233_s4, 4  ;;  %s222_s19 = scalar_lea.sflag [#allocation4], %s686_s25  ;;  %s238_s8 = int_to_ptr.hbm [resolvable:$true] %s237_s8 }
  0x28   : > { %s493_s15 = sshra.s32 %s238_s8, 4  ;;  %s499_s22 = scalar_lea.hbm %s734_s2, 16  ;;  %s494_s15 = int_to_ptr.hbm [resolvable:$true] %s493_s15 }
  0x29   : > { %s495_s16 = scalar_lea.hbm %s494_s15, 8  ;;  %p500_p11 = scmp.lt.s32.totalorder %s494_s15, %s734_s2 }
  0x2a   : > { %p496_p1 = scmp.ne.s32.totalorder %s494_s15, %s495_s16  ;;  %p501_p12 = scmp.lt.s32.totalorder %s499_s22, %s495_s16 }
  0x2c   : > { %p497_p4 = pnand %p496_p1, %p662_p5  ;;  %p502_p13 = por %p501_p12, %p500_p11 }
  0x2e   : > { %p498_p8 = pneg %p497_p4 }
  0x30   : > { %p503_p0 = pnand %p502_p13, %p498_p8 }
  0xa4   : > { %v216_v2 = vpop.f32.mrf.mxu0 }
  0xa5   : > { %220 = vst.msk [vmem:[%s192_s5] sm:$0xff] %vm219_vm1, %v216_v2 }
  0xa6   : > { %506 = shalt.err (!%p503_p0)
}
  0xa7   : > { %352 = dma.vmem_to_hbm [thread:$0]  (%p662_p5), %s236_s7, 128, %s238_s8, %s222_s19  }
  0xa8 PF: > { %s249_s25 = sand.u32 1, %s545_s9   ;;  %p363_p3 = pnand %p334_p9, %p632_p6 }
  0xa9   : > { %s250_s26 = scalar_lea.sflag [#allocation4], %s249_s25 }
  0xaa   : > { %p364_p7 = pneg %p363_p3 }
  0xac   : > { %540 = dma.done.wait (%p364_p7), %s250_s26, 128  }
  0xad   : > { %542 = vsyncadd (%p364_p7), %s250_s26, 4294967168  ;;  %s19_s14 = sadd.s32 1, %s565_s14   ;;  %s742_s9 = smov %s549_s10 }
  0xae   : > { %p16_p10 = scmp.ge.s32.totalorder %s19_s14, 4   ;;  %s743_s10 = smov %s553_s11 }
  0xaf   : > { %s744_s11 = smov %s671_s6  ;;  %s745_s12 = smov %s561_s13 }
  0xb0   : > { %s746_s13 = smov %s748_s27  ;;  %18 = sbr.rel (!%p16_p10) target bundleno = 7 (0x7), region = 78 }
  0xb5   :  { %256 = vsyncpa [#allocation3], 1 }
  0xb6   :  { %258 = vsyncpa [#allocation3 + $0x1], 1 }
  0xb7   :  { %259 = vsyncpa [#allocation6], 1 }
  0xb8   :  { %261 = vsyncpa [#allocation6 + $0x1], 1 }
  0xb9   :  { %262 = vsyncpa [#allocation4], 1 }
  0xba   :  { %264 = vsyncpa [#allocation4 + $0x1], 1 }

</bundles_post_ra>
